<compile_context>
chip_gen: v5e
topology: v5e:2x2
jax: 0.10.0
libtpu: 0.0.40
codegen_flags: <defaults>
</compile_context>

<pallas_src>
import numpy as np
import jax
import jax.numpy as jnp
from jax.experimental import pallas as pl
from jax.experimental.pallas import tpu as pltpu


# ----------------------------------------------------------------------------
# Host-side glue: deterministic synthetic token ids (stand-in for tokenizer)
# and the instruction-length pattern matching from the torch module.
# ----------------------------------------------------------------------------
# TODO(synk): tokenizer lookup itself has no Pallas equivalent; host-side
# pattern matching is kept identical to the torch module.
TOKEN_IDS = {
    '<s>': 1, '▁<': 523, '<': 28789, '|': 28766,
    'embed': 18320, '>': 28767, '<0x0A>': 13, 'user': 1838,
}


def _tokens_to_ids(tokens):
    return np.array([TOKEN_IDS[t] for t in tokens])


USER_PATTERN_IDS = _tokens_to_ids(['▁<', '|', 'user', '|', '>', '<0x0A>'])
EMBED_NEWLINE_PATTERN_IDS = _tokens_to_ids(
    ['<0x0A>', '<', '|', 'embed', '|', '>', '<0x0A>'])
EMBED_PATTERN_IDS = _tokens_to_ids(['▁<', '|', 'embed', '|', '>', '<0x0A>'])


def _find_array(arr, target, start_idx=0, end_idx=None):
    if start_idx < 0:
        raise ValueError('`start_idx` must be non-negative')
    if len(arr) == 0 or len(target) == 0:
        raise ValueError('Empty `arr` or `target` not allowed')
    arr_len, target_len = len(arr), len(target)
    if end_idx is None:
        end_idx = arr_len
    for i in range(start_idx, min(end_idx, arr_len - target_len + 1)):
        if (arr[i:i + target_len] == target).all():
            return i
    return -1


def _get_instruction_len(prompt_token_ids):
    if prompt_token_ids[0] != TOKEN_IDS['<s>']:
        return 0
    embed_pattern_ids = EMBED_PATTERN_IDS
    if _find_array(prompt_token_ids, USER_PATTERN_IDS,
                   start_idx=1, end_idx=2) == 1:
        embed_pattern_ids = EMBED_NEWLINE_PATTERN_IDS
    idx = _find_array(prompt_token_ids, embed_pattern_ids, start_idx=1)
    if idx != -1:
        return idx + len(embed_pattern_ids)
    return 1


# ----------------------------------------------------------------------------
# Pallas kernel: out = (W @ hidden) * inv_count, W built in-kernel.
# ----------------------------------------------------------------------------
def _make_pool_kernel(total_tokens: int, tile_t: int, mask_last_tile: bool):
    def kernel(starts_ref, ends_ref, invc_ref, hs_ref, out_ref):
        k = pl.program_id(1)                      # token-tile (reduction) idx

        @pl.when(k == 0)
        def _init():
            out_ref[...] = jnp.zeros_like(out_ref)

        hs = hs_ref[...]
        tok0 = k * tile_t
        b_pad = starts_ref.shape[0]

        # Selection matrix W[b, t] = 1 iff token t is pooled for prompt b.
        # {0, 1} is exact in any float dtype, so the reduction runs natively
        # on the MXU in the hidden dtype with f32 accumulation.
        tok = jax.lax.broadcasted_iota(jnp.int32, (b_pad, tile_t), 1) + tok0
        w = ((tok >= starts_ref[...]) & (tok < ends_ref[...])).astype(hs.dtype)

        if mask_last_tile:
            # Last token tile may be partial: rows >= T hold undefined VMEM
            # data (0 * NaN = NaN), so zero them explicitly. Cheap VPU work,
            # hidden under the hs DMA.
            row = jax.lax.broadcasted_iota(jnp.int32, hs.shape, 0) + tok0
            hs = jnp.where(row < total_tokens, hs, jnp.zeros_like(hs))

        out_ref[...] += jnp.dot(w, hs, preferred_element_type=jnp.float32)

        @pl.when(k == pl.num_programs(1) - 1)
        def _finalize():
            out_ref[...] = out_ref[...] * invc_ref[...]

    return kernel


def _round_up(x: int, m: int) -> int:
    return (x + m - 1) // m * m


def _select_tiles(total_tokens: int, hidden: int, itemsize: int):
    """Pick (tile_t, tile_d): lane/sublane aligned, >=2 D tiles when possible
    (v7x megacore), hs block capped at 8 MiB (fits 32 MiB scoped VMEM when
    double-buffered on all of v5e/v6e/v7x)."""
    d_pad = _round_up(hidden, 128)
    if d_pad >= 256:
        tile_d = next(c for c in (1024, 512, 256, 128)
                      if d_pad % c == 0 and d_pad // c >= 2)
    else:
        tile_d = d_pad                                    # == 128
    max_block_bytes = 8 * 1024 * 1024
    t_cap = max_block_bytes // (tile_d * itemsize)
    tile_t = min(2048, _round_up(total_tokens, 128), t_cap)
    tile_t = max(128, (tile_t // 128) * 128)
    return tile_t, tile_d


def gritlm_mean_pool(hidden_states, prompt_lens, instr_lens):
    """hidden_states: [total_tokens, hidden]; returns [num_prompts, hidden] f32."""
    T, D = hidden_states.shape
    B = int(prompt_lens.shape[0])
    itemsize = jnp.dtype(hidden_states.dtype).itemsize

    prompt_lens = jnp.asarray(prompt_lens).astype(jnp.int32)
    instr_lens = jnp.asarray(instr_lens).astype(jnp.int32)
    offsets = jnp.concatenate(
        [jnp.zeros((1,), jnp.int32),
         jnp.cumsum(prompt_lens)[:-1].astype(jnp.int32)])
    starts = offsets + instr_lens            # [B] pooled-range start (absolute)
    ends = offsets + prompt_lens             # [B] pooled-range end   (absolute)

    counts = (ends - starts).astype(jnp.float32)
    # Empty pooled range (instr_len == prompt_len) -> NaN row, matching the
    # torch reference. Padded rows -> 0, sliced off.
    inv_counts = jnp.where(counts > 0, 1.0 / jnp.maximum(counts, 1.0), jnp.nan)

    # Pad B to the sublane packing of the hidden dtype (f32:8, bf16:16, i8:32).
    packing = max(8, 32 // itemsize)
    B_pad = _round_up(B, packing)
    pad_b = B_pad - B
    starts_p = jnp.pad(starts, (0, pad_b)).reshape(B_pad, 1)      # pad rows: [0,0)
    ends_p = jnp.pad(ends, (0, pad_b)).reshape(B_pad, 1)          #  -> empty -> W=0
    inv_p = jnp.pad(inv_counts, (0, pad_b)).reshape(B_pad, 1)

    tile_t, tile_d = _select_tiles(T, D, itemsize)
    grid = (pl.cdiv(D, tile_d), pl.cdiv(T, tile_t))
    mask_last_tile = (T % tile_t) != 0

    kernel = _make_pool_kernel(T, tile_t, mask_last_tile)

    out = pl.pallas_call(
        kernel,
        out_shape=jax.ShapeDtypeStruct((B_pad, D), jnp.float32),
        grid_spec=pltpu.PrefetchScalarGridSpec(
            num_scalar_prefetch=0,
            grid=grid,
            in_specs=[
                pl.BlockSpec((B_pad, 1), lambda j, k: (0, 0)),        # starts
                pl.BlockSpec((B_pad, 1), lambda j, k: (0, 0)),        # ends
                pl.BlockSpec((B_pad, 1), lambda j, k: (0, 0)),        # 1/count
                pl.BlockSpec((tile_t, tile_d), lambda j, k: (k, j)),  # hidden
            ],
            out_specs=pl.BlockSpec((B_pad, tile_d), lambda j, k: (0, j)),
        ),
        compiler_params=pltpu.CompilerParams(
            dimension_semantics=("parallel", "arbitrary"),
            vmem_limit_bytes=32 * 1024 * 1024),
    )(starts_p, ends_p, inv_p, hidden_states)

    return out[:B, :]


# ----------------------------------------------------------------------------
# Example run
# ----------------------------------------------------------------------------
if __name__ == "__main__":
    HIDDEN = 256

    # Prompt 1: <s> + user pattern + query tokens + embed-newline pattern + doc
    prompt1 = np.concatenate([
        np.array([TOKEN_IDS['<s>']]),
        USER_PATTERN_IDS,
        np.array([100, 101, 102]),
        EMBED_NEWLINE_PATTERN_IDS,
        np.array([200, 201, 202, 203]),
    ])
    # Prompt 2: <s> + embed pattern + doc tokens
    prompt2 = np.concatenate([
        np.array([TOKEN_IDS['<s>']]),
        EMBED_PATTERN_IDS,
        np.array([300, 301, 302, 303, 304]),
    ])
    prompts = [prompt1, prompt2]

    prompt_lens_np = np.array([len(p) for p in prompts], dtype=np.int32)
    instr_lens_np = np.array([_get_instruction_len(p) for p in prompts],
                             dtype=np.int32)
    total_tokens = int(prompt_lens_np.sum())

    key = jax.random.PRNGKey(0)
    hidden_states = jax.random.normal(key, (total_tokens, HIDDEN),
                                      dtype=jnp.float32)

    def np_ref(hs_np):
        offset = 0
        rows = []
        for p_len, i_len in zip(prompt_lens_np, instr_lens_np):
            rows.append(hs_np[offset + i_len: offset + p_len].mean(axis=0))
            offset += int(p_len)
        return np.stack(rows).astype(np.float32)

    # f32 path (as the torch module receives it).
    out_f32 = gritlm_mean_pool(hidden_states,
                               jnp.asarray(prompt_lens_np),
                               jnp.asarray(instr_lens_np))
    out_f32 = jax.block_until_ready(out_f32)
    ref_f32 = np_ref(np.asarray(hidden_states, dtype=np.float32))
    np.testing.assert_allclose(np.asarray(out_f32), ref_f32,
                               rtol=1e-2, atol=2e-2)

    # bf16 hidden states (recommended production config: halves the HBM
    # stream; accumulation stays exact f32 on the MXU).
    hs_bf16 = hidden_states.astype(jnp.bfloat16)
    out_bf16 = gritlm_mean_pool(hs_bf16,
                                jnp.asarray(prompt_lens_np),
                                jnp.asarray(instr_lens_np))
    out_bf16 = jax.block_until_ready(out_bf16)
    ref_bf16 = np_ref(np.asarray(hs_bf16).astype(np.float32))
    np.testing.assert_allclose(np.asarray(out_bf16), ref_bf16,
                               rtol=1e-2, atol=2e-2)

    print("KERNEL_OK")
</pallas_src>

<mosaic_0001>
module attributes {stable_mosaic.version = 11 : i64} {
  func.func @kernel(%arg0: i32, %arg1: i32, %arg2: memref<8x1xi32, #tpu.memory_space<vmem>>, %arg3: memref<8x1xi32, #tpu.memory_space<vmem>>, %arg4: memref<8x1xf32, #tpu.memory_space<vmem>>, %arg5: memref<128x128xf32, #tpu.memory_space<vmem>>, %arg6: memref<8x128xf32, #tpu.memory_space<vmem>>) attributes {dimension_semantics = [#tpu.dimension_semantics<parallel>, #tpu.dimension_semantics<arbitrary>], iteration_bounds = array<i64: 2, 1>, scalar_prefetch = 0 : i64, scratch_operands = 0 : i64, tpu.core_type = #tpu.core_type<tc>, window_params = [{pipeline_mode = #tpu.pipeline_mode<synchronous>, transform_indices = @transform_0, window_bounds = array<i64: 8, 1>}, {pipeline_mode = #tpu.pipeline_mode<synchronous>, transform_indices = @transform_1, window_bounds = array<i64: 8, 1>}, {pipeline_mode = #tpu.pipeline_mode<synchronous>, transform_indices = @transform_2, window_bounds = array<i64: 8, 1>}, {transform_indices = @transform_3, window_bounds = array<i64: 128, 128>}, {transform_indices = @transform_4, window_bounds = array<i64: 8, 128>}]} {
    %c0_i32 = arith.constant 0 : i32
    %0 = arith.cmpi eq, %arg1, %c0_i32 : i32
    %1 = arith.extui %0 : i1 to i32
    %c0_i32_0 = arith.constant 0 : i32
    %2 = arith.cmpi ne, %1, %c0_i32_0 : i32
    scf.if %2 {
      %cst_13 = arith.constant 0.000000e+00 : f32
      %31 = vector.broadcast %cst_13 : f32 to vector<8x128xf32>
      %c0_14 = arith.constant 0 : index
      %c0_15 = arith.constant 0 : index
      %32 = vector.load %arg6[%c0_14, %c0_15] : memref<8x128xf32, #tpu.memory_space<vmem>>, vector<8x128xf32>
      tpu.vector_store %arg6[%c0_14, %c0_15], %31 {strides = array<i32>} : memref<8x128xf32, #tpu.memory_space<vmem>>, vector<8x128xf32>,
    } else {
    }
    %c0 = arith.constant 0 : index
    %c0_1 = arith.constant 0 : index
    %3 = vector.load %arg5[%c0, %c0_1] : memref<128x128xf32, #tpu.memory_space<vmem>>, vector<128x128xf32>
    %c128_i32 = arith.constant 128 : i32
    %4 = arith.muli %arg1, %c128_i32 : i32
    %5 = tpu.iota {dimensions = array<i32: 1>} : vector<8x128xi32>
    %6 = vector.broadcast %4 : i32 to vector<8x128xi32>
    %7 = arith.addi %5, %6 : vector<8x128xi32>
    %c0_2 = arith.constant 0 : index
    %c0_3 = arith.constant 0 : index
    %8 = vector.load %arg2[%c0_2, %c0_3] : memref<8x1xi32, #tpu.memory_space<vmem>>, vector<8x1xi32>
    %9 = vector.broadcast %8 : vector<8x1xi32> to vector<8x128xi32>
    %10 = arith.cmpi sge, %7, %9 : vector<8x128xi32>
    %c0_4 = arith.constant 0 : index
    %c0_5 = arith.constant 0 : index
    %11 = vector.load %arg3[%c0_4, %c0_5] : memref<8x1xi32, #tpu.memory_space<vmem>>, vector<8x1xi32>
    %12 = vector.broadcast %11 : vector<8x1xi32> to vector<8x128xi32>
    %13 = arith.cmpi slt, %7, %12 : vector<8x128xi32>
    %14 = arith.andi %10, %13 : vector<8x128xi1>
    %15 = arith.extui %14 : vector<8x128xi1> to vector<8x128xi32>
    %16 = arith.sitofp %15 : vector<8x128xi32> to vector<8x128xf32>
    %17 = tpu.iota {dimensions = array<i32: 0>} : vector<128x128xi32>
    %18 = vector.broadcast %4 : i32 to vector<128x128xi32>
    %19 = arith.addi %17, %18 : vector<128x128xi32>
    %c33_i32 = arith.constant 33 : i32
    %20 = vector.broadcast %c33_i32 : i32 to vector<128x128xi32>
    %21 = arith.cmpi slt, %19, %20 : vector<128x128xi32>
    %cst = arith.constant 0.000000e+00 : f32
    %22 = vector.broadcast %cst : f32 to vector<128x128xf32>
    %23 = arith.select %21, %3, %22 : vector<128x128xi1>, vector<128x128xf32>
    %c0_6 = arith.constant 0 : index
    %c0_7 = arith.constant 0 : index
    %24 = vector.load %arg6[%c0_6, %c0_7] : memref<8x128xf32, #tpu.memory_space<vmem>>, vector<8x128xf32>
    %cst_8 = arith.constant dense<0.000000e+00> : vector<8x128xf32>
    %25 = tpu.matmul %16, %23, %cst_8 {dimension_numbers = #tpu.dot_dimension_numbers<[1], [0], [0], [1], [0, 0, 1, 1], [], []>} : vector<8x128xf32>, vector<128x128xf32>, vector<8x128xf32> -> vector<8x128xf32>
    %26 = arith.addf %24, %25 : vector<8x128xf32>
    %c0_9 = arith.constant 0 : index
    %c0_10 = arith.constant 0 : index
    %27 = vector.load %arg6[%c0_9, %c0_10] : memref<8x128xf32, #tpu.memory_space<vmem>>, vector<8x128xf32>
    tpu.vector_store %arg6[%c0_9, %c0_10], %26 {strides = array<i32>} : memref<8x128xf32, #tpu.memory_space<vmem>>, vector<8x128xf32>,
    %c0_i32_11 = arith.constant 0 : i32
    %28 = arith.cmpi eq, %arg1, %c0_i32_11 : i32
    %29 = arith.extui %28 : i1 to i32
    %c0_i32_12 = arith.constant 0 : i32
    %30 = arith.cmpi ne, %29, %c0_i32_12 : i32
    scf.if %30 {
      %c0_13 = arith.constant 0 : index
      %c0_14 = arith.constant 0 : index
      %31 = vector.load %arg6[%c0_13, %c0_14] : memref<8x128xf32, #tpu.memory_space<vmem>>, vector<8x128xf32>
      %c0_15 = arith.constant 0 : index
      %c0_16 = arith.constant 0 : index
      %32 = vector.load %arg4[%c0_15, %c0_16] : memref<8x1xf32, #tpu.memory_space<vmem>>, vector<8x1xf32>
      %33 = vector.broadcast %32 : vector<8x1xf32> to vector<8x128xf32>
      %34 = arith.mulf %31, %33 : vector<8x128xf32>
      %c0_17 = arith.constant 0 : index
      %c0_18 = arith.constant 0 : index
      %35 = vector.load %arg6[%c0_17, %c0_18] : memref<8x128xf32, #tpu.memory_space<vmem>>, vector<8x128xf32>
      tpu.vector_store %arg6[%c0_17, %c0_18], %34 {strides = array<i32>} : memref<8x128xf32, #tpu.memory_space<vmem>>, vector<8x128xf32>,
    } else {
    }
    return
  }
  func.func @transform_0(%arg0: i32, %arg1: i32) -> (i32, i32) {
    %c0_i32 = arith.constant 0 : i32
    %c0_i32_0 = arith.constant 0 : i32
    %c0_i32_1 = arith.constant 0 : i32
    return %c0_i32, %c0_i32_0 : i32, i32
  }
  func.func @transform_1(%arg0: i32, %arg1: i32) -> (i32, i32) {
    %c0_i32 = arith.constant 0 : i32
    %c0_i32_0 = arith.constant 0 : i32
    %c0_i32_1 = arith.constant 0 : i32
    return %c0_i32, %c0_i32_0 : i32, i32
  }
  func.func @transform_2(%arg0: i32, %arg1: i32) -> (i32, i32) {
    %c0_i32 = arith.constant 0 : i32
    %c0_i32_0 = arith.constant 0 : i32
    %c0_i32_1 = arith.constant 0 : i32
    return %c0_i32, %c0_i32_0 : i32, i32
  }
  func.func @transform_3(%arg0: i32, %arg1: i32) -> (i32, i32) {
    %c0_i32 = arith.constant 0 : i32
    return %arg1, %arg0 : i32, i32
  }
  func.func @transform_4(%arg0: i32, %arg1: i32) -> (i32, i32) {
    %c0_i32 = arith.constant 0 : i32
    %c0_i32_0 = arith.constant 0 : i32
    return %c0_i32, %arg0 : i32, i32
  }
}

</mosaic_0001>

<bundles_post_ra>
// kernel: tpu_custom_call.1
= control target key start
LH: loop header
LB: loop body
LE: loop exit
PB: predicated region body
PF: predicated region fallthrough
CT: control target
= control target key end

     0   :  { %9 = vsyncpa [#allocation3], 0  ;;  %s820_s0 = inlined_call_operand.vmem [shape: s32[8,1], index: 0, kind: input, shape index: {}]   ;;  %s821_s1 = inlined_call_operand.vmem [shape: s32[8,1], index: 1, kind: input, shape index: {}]   ;;  %s822_s2 = inlined_call_operand.vmem [shape: f32[8,1], index: 2, kind: input, shape index: {}]   ;;  %s823_s3 = inlined_call_operand.hbm [shape: f32[33,256], index: 3, kind: input, shape index: {}]   ;;  %s824_s4 = inlined_call_operand.hbm [shape: f32[8,256], index: 4, kind: output, shape index: {}]  }
   0x1   :  { %11 = vsyncpa [#allocation3 + $0x1], 0 }
   0x2   :  { %12 = vsyncpa [#allocation4], 0 }
   0x3   :  { %14 = vsyncpa [#allocation4 + $0x1], 0  ;;  %s695_s15 = smov 0   ;;  %s697_s16 = smov 0  }
   0x4   :  { %s699_s17 = smov 0   ;;  %s701_s18 = smov 0  }
   0x5   :  { %s703_s19 = smov 0   ;;  %s705_s20 = smov 0  }
   0x6 LB: > { %s477_s21 = sadd.s32 4294967295, %s663_s20   ;;  %s478_s22 = sadd.s32 4294967294, %s663_s20   ;;  %s663_s20 = sphi %s705_s20, %s20_s20   ;;  %s659_s19 = sphi %s703_s19, %s832_s19   ;;  %s655_s18 = sphi %s701_s18, %s831_s18   ;;  %s651_s17 = sphi %s699_s17, %s830_s17   ;;  %s647_s16 = sphi %s697_s16, %s829_s16   ;;  %s643_s15 = sphi %s695_s15, %s828_s15  }
   0x7   : > { %s32_s23 = sadd.s32 1, %s659_s19  ;;  %s104_s24 = sadd.s32 1, %s651_s17 }
   0x8   : > { %p34_p0 = scmp.ge.s32.totalorder %s32_s23, 2  ;;  %p111_p1 = scmp.ne.s32.totalorder %s651_s17, %s647_s16 }
   0x9   : > { %p112_p2 = scmp.eq.s32.totalorder %s663_s20, 0  ;;  %p117_p3 = scmp.ne.s32.totalorder %s647_s16, %s643_s15 }
   0xa   : > { %s834_s23 = smov (%p34_p0, %s32_s23), 0  ;;  %p118_p5 = scmp.eq.s32.totalorder %s477_s21, 0 }
   0xb   : > { %p113_p4 = por %p112_p2, %p111_p1  ;;  %s100_s25 = ssub.s32 %s659_s19, %s834_s23 }
   0xc   : > { %p141_p6 = scmp.eq.s32.totalorder %s477_s21, 1  ;;  %p102_p7 = scmp.eq.s32.totalorder %s100_s25, 0 }
   0xd   : > { %p738_p8 = por %p118_p5, %p117_p3  ;;  %p147_p10 = scmp.eq.s32.totalorder %s478_s22, 1 }
   0xe   : > { %p742_p9 = por %p141_p6, %p111_p1  ;;  %p480_p12 = scmp.ge.s32.totalorder %s663_s20, 2 }
   0xf   : > { %s747_s28 = scalar_select %p102_p7, %s651_s17, %s104_s24  }
  0x10   : > { %p749_p11 = por %p147_p10, %p117_p3  ;;  %172 = sbr.rel (%p480_p12) target bundleno = 31 (0x1f), region = 28 }
  0x15   : > { %175 = sbr.rel (!%p113_p4) target bundleno = 31 (0x1f), region = 32  ;;  %s176_s30 = sand.u32 (%p113_p4), 1, %s651_s17  }
  0x16   : > { %s481_s5 = sshll.u32 (%p113_p4), %s176_s30, 7  ;;  %s177_s6 = scalar_lea.sflag (%p113_p4), [#allocation3], %s176_s30 }
  0x17   : > { %s180_s7 = scalar_lea.vmem (%p113_p4), [#allocation2], %s481_s5 }
  0x1a   : > { %186 = vsyncadd %s177_s6, 1408  ;;  %s482_s8 = sshll.u32 %s659_s19, 3  ;;  %s195_s9 = sshll.u32 %s180_s7, 4  ;;  %s196_s9 = int_to_ptr.vmem [resolvable:$true] %s195_s9 }
  0x1b   : > { %s191_s12 = scalar_lea.hbm %s823_s3, %s482_s8  ;;  %s665_s14 = smov 256  }
  0x1c   : > { %s193_s13 = sshll.u32 %s191_s12, 4  ;;  %s666_s21 = smov 128   ;;  %s194_s13 = int_to_ptr.hbm [resolvable:$true] %s193_s13 }
  0x1d   : > { %s667_s22 = smov 8  }
  0x1e   : > { %201 = dma.hbm_to_vmem [thread:$0]  %s194_s13, 640, %s196_s9, %s177_s6, %s665_s14, %s666_s21, %s667_s22  }
  0x1f PF: > { %p483_p13 = scmp.ge.s32.totalorder %s663_s20, 1  ;;  %p203_p0 = scmp.lt.s32.totalorder %s663_s20, 3 }
  0x21   : > { %p204_p1 = pnand %p483_p13, %p203_p0 }
  0x22   : > { %s764_s24 = sand.u32 (!%p204_p1), 1, %s647_s16  }
  0x23   : > { %207 = sbr.rel (%p204_p1) target bundleno = 299 (0x12b), region = 36  ;;  %s484_s25 = sshll.u32 (!%p204_p1), %s764_s24, 7 }
  0x24   : > { %s210_s30 = scalar_lea.sflag (!%p204_p1), [#allocation3], %s764_s24  ;;  %s213_s5 = scalar_lea.vmem (!%p204_p1), [#allocation2], %s484_s25 }
  0x28   : > { %634 = dma.done.wait (%p738_p8), %s210_s30, 2048  }
  0x29   : > { %636 = vsyncadd (%p738_p8), %s210_s30, 4294965248  ;;  %v668_v0 = vmov 0   ;;  %v268_v1 = vld [vmem:[%s820_s0] sm:$0xff]  ;;  %v264_v3 = vlaneseq  ;;  %v250_v7 = vld [vmem:[%s213_s5 + $0x18] sm:$0xff]  ;;  %v669_v15 = vmov 1.0   ;;  %s485_s11 = sshll.u32 %s764_s24, 3 }
  0x2a   : > { %555 = vset.pattern.permute.xlu0 %v668_v0  ;;  %556 = vset.pattern.permute.xlu1 %v668_v0  ;;  %v273_v2 = vld [vmem:[%s821_s1] sm:$0xff]  ;;  %v249_v8 = vld [vmem:[%s213_s5 + $0x10] sm:$0xff]  ;;  %v248_v9 = vld [vmem:[%s213_s5 + $0x8] sm:$0xff]  ;;  %s490_s12 = sshll.u32 %s655_s18, 3  ;;  %s238_s22 = scalar_lea.vmem [#allocation5], %s485_s11 }
  0x2b   : > { %270 = vperm.xlu0 %555, %v268_v1   ;;  %v282_v4 = vshrl.u32 %v264_v3, 7  ;;  %v251_v6 = vld [vmem:[%s213_s5 + $0x20] sm:$0xff]  ;;  %v265_v13 = vand.u32 127, %v264_v3  ;;  %s392_s21 = scalar_lea.hbm %s824_s4, %s490_s12  ;;  %s394_s25 = sshll.u32 %s238_s22, 4  ;;  %s395_s25 = int_to_ptr.vmem [resolvable:$true] %s394_s25 }
  0x2c   : > { %v247_v10 = vld [vmem:[%s213_s5] sm:$0xff]  ;;  %s396_s30 = sshll.u32 %s392_s21, 4  ;;  %s382_s5 = scalar_lea.sflag [#allocation4], %s764_s24  ;;  %s397_s30 = int_to_ptr.hbm [resolvable:$true] %s396_s30 }
  0x2d   : > { %v286_v5 = vadd.s32 32, %v282_v4  ;;  %v373_v11 = vld [vmem:[%s822_s2] sm:$0xff]  ;;  %s595_s6 = sshra.s32 %s397_s30, 4  ;;  %s601_s9 = scalar_lea.hbm %s824_s4, 16  ;;  %s596_s6 = int_to_ptr.hbm [resolvable:$true] %s595_s6 }
  0x2e   : > { %376 = vperm.xlu1 %556, %v373_v11   ;;  %s597_s7 = scalar_lea.hbm %s596_s6, 8  ;;  %p602_p5 = scmp.lt.s32.totalorder %s596_s6, %s824_s4 }
  0x2f   : > { %vm318_vm0 = vcmp.lt.s32.totalorder %v286_v5, 33  ;;  %p598_p2 = scmp.ne.s32.totalorder %s596_s6, %s597_s7  ;;  %p603_p6 = scmp.lt.s32.totalorder %s601_s9, %s597_s7 }
  0x30   : > { %487 = vmatpush.msk.msra.mxu0 %vm318_vm0, %v251_v6 }
  0x31   : > { %p599_p3 = pnand %p598_p2, %p742_p9  ;;  %p604_p7 = por %p603_p6, %p602_p5 }
  0x32   : > { %359 = vmatpush.msra.mxu0 %v250_v7 }
  0x33   : > { %275 = vperm.xlu0 %555, %v273_v2   ;;  %p600_p4 = pneg %p599_p3 }
  0x34   : > { %360 = vmatpush.msra.mxu0 %v249_v8 }
  0x35   : > { %p605_p8 = pnand %p604_p7, %p600_p4 }
  0x36   : > { %361 = vmatpush.msra.mxu0 %v248_v9 }
  0x38   : > { %362 = vmatpush.msra.mxu0 %v247_v10 }
  0x9d   : > { %v271_v12 = vpop.permute.xlu0 %270 }
  0x9e   : > { %vm272_vm1 = vcmp.ge.s32.totalorder %v265_v13, %v271_v12 }
  0xa0   : > { %v377_v17 = vpop.permute.xlu1 %376 }
  0xa5   : > { %v276_v14 = vpop.permute.xlu0 %275 }
  0xa6   : > { %vm277_vm2 = vcmp.lt.s32.totalorder %v265_v13, %v276_v14 }
  0xa7   : > { %vm278_vm3 = vmand %vm272_vm1, %vm277_vm2 }
  0xa8   : > { %488 = vmatmul.msk.f32.vlgmr.msra.gmra.mxu0 %vm278_vm3, %v669_v15 }
 0x125   : > { %v364_v16 = vpop.f32.mrf.mxu0 }
 0x126   : > { %v379_v18 = vmul.f32 %v377_v17, %v364_v16 }
 0x128   : > { %380 = vst [vmem:[%s238_s22] sm:$0xff] %v379_v18 }
 0x129   : > { %608 = shalt.err (!%p605_p8)
}
 0x12a   : > { %494 = dma.vmem_to_hbm [thread:$0]  (%p742_p9), %s395_s25, 128, %s397_s30, %s382_s5  }
 0x12b PF: > { %s408_s24 = sand.u32 1, %s643_s15   ;;  %p497_p10 = pnand %p480_p12, %p749_p11 }
 0x12c   : > { %s409_s11 = scalar_lea.sflag [#allocation4], %s408_s24 }
 0x12d   : > { %p498_p13 = pneg %p497_p10 }
 0x12f   : > { %638 = dma.done.wait (%p498_p13), %s409_s11, 128  }
 0x130   : > { %640 = vsyncadd (%p498_p13), %s409_s11, 4294967168  ;;  %s20_s20 = sadd.s32 1, %s663_s20   ;;  %s828_s15 = smov %s647_s16 }
 0x131   : > { %p17_p0 = scmp.ge.s32.totalorder %s20_s20, 4   ;;  %s829_s16 = smov %s651_s17 }
 0x132   : > { %s830_s17 = smov %s747_s28  ;;  %s831_s18 = smov %s659_s19 }
 0x133   : > { %s832_s19 = smov %s834_s23  ;;  %19 = sbr.rel (!%p17_p0) target bundleno = 6 (0x6), region = 89 }
 0x138   :  { %415 = vsyncpa [#allocation3], 1 }
 0x139   :  { %417 = vsyncpa [#allocation3 + $0x1], 1 }
 0x13a   :  { %418 = vsyncpa [#allocation4], 1 }
 0x13b   :  { %420 = vsyncpa [#allocation4 + $0x1], 1 }

</bundles_post_ra>
